<compile_context>
chip_gen: v6e
topology: v6e:2x2x1
jax: 0.10.0
libtpu: 0.0.40
codegen_flags: <defaults>
</compile_context>

<pallas_src>
import functools

import jax
import jax.numpy as jnp
from jax import lax
from jax.experimental import pallas as pl
from jax.experimental.pallas import tpu as pltpu

ALPHA = 1.0  # matches FocalLoss(alpha=1, gamma=2)


def _focal_loss_kernel(logits_ref, targets_ref, out_ref, *, batch_size, block_rows):
    # logits_ref : (TB, C) native dtype in VMEM
    # targets_ref: (TB, 1) int32 in VMEM
    # out_ref    : (8, 128) f32 tile; one per grid step (partial sum, lane-dense store)
    i = pl.program_id(0)

    logits = logits_ref[...].astype(jnp.float32)                 # upcast in-register
    targets = targets_ref[...]                                   # (TB, 1) int32
    tb, c = logits.shape

    # Numerically stable log-softmax pieces (per row).
    row_max = jnp.max(logits, axis=-1, keepdims=True)            # (TB, 1)
    shifted = logits - row_max                                   # (TB, C)
    sum_exp = jnp.sum(jnp.exp(shifted), axis=-1, keepdims=True)  # (TB, 1)

    # Gather shifted target logit with a masked select (no dynamic gather on TPU,
    # no f32 one-hot temporary).
    class_ids = lax.broadcasted_iota(jnp.int32, (tb, c), dimension=1)
    target_shifted = jnp.sum(
        jnp.where(class_ids == targets, shifted, 0.0), axis=-1, keepdims=True)

    # ce = logsumexp(x) - x[target] = log(sum_exp) - shifted[target]  (row_max cancels)
    ce = jnp.log(sum_exp) - target_shifted                       # (TB, 1)

    # focal = alpha * (1 - pt)^2 * ce, pt = exp(-ce).  Explicit square -> VPU only.
    pt = jnp.exp(-ce)
    om = 1.0 - pt
    focal = ALPHA * om * om * ce                                 # (TB, 1)

    # Mask padded rows of the (possibly partial) last block before reducing.
    row_ids = i * block_rows + lax.broadcasted_iota(jnp.int32, (tb, 1), 0)
    focal = jnp.where(row_ids < batch_size, focal, 0.0)

    partial = jnp.sum(focal)                                     # scalar partial sum
    # Lane-dense unmasked store; the wrapper reads lane 0 / sublane 0 of this tile.
    out_ref[...] = jnp.full(out_ref.shape, partial, dtype=jnp.float32)


def _choose_block_rows(batch, num_classes, itemsize):
    # Minimum sublane multiple for the input dtype (f32: 8, bf16: 16, int8/fp8: 32).
    sublane = {4: 8, 2: 16, 1: 32}.get(itemsize, 8)
    # ~2 MiB logits block: >85% of HBM roofline while staying comfortably inside
    # the scoped-VMEM defaults on v5e (16 MiB), v6e (32 MiB) and v7x (32 MiB),
    # including double buffering.
    target_bytes = 2 * 1024 * 1024
    tb = target_bytes // max(1, num_classes * itemsize)
    tb = max(sublane, (tb // sublane) * sublane)
    if tb >= batch:
        return batch  # single block covering the full batch (full-dim block is legal)
    return int(tb)


def focal_loss(inputs, targets):
    """inputs: [B, C] float logits (any float dtype), targets: [B] integer class ids."""
    if inputs.ndim != 2 or targets.ndim != 1:
        raise ValueError(
            "Inputs should be [batch_size, num_classes], and targets should be [batch_size]"
        )
    B, C = inputs.shape
    itemsize = jnp.dtype(inputs.dtype).itemsize
    tb = _choose_block_rows(B, C, itemsize)
    num_blocks = (B + tb - 1) // tb

    targets2d = targets.astype(jnp.int32).reshape(B, 1)

    kernel = functools.partial(_focal_loss_kernel, batch_size=B, block_rows=tb)

    cost = pl.CostEstimate(
        flops=6 * B * C,
        transcendentals=B * C + 3 * B,          # exp per element + log/exp per row
        bytes_accessed=B * C * itemsize + B * 4 + num_blocks * 8 * 128 * 4,
    )

    partials = pl.pallas_call(
        kernel,
        out_shape=jax.ShapeDtypeStruct((8, num_blocks * 128), jnp.float32),
        grid_spec=pl.GridSpec(
            grid=(num_blocks,),
            in_specs=[
                pl.BlockSpec((tb, C), lambda i: (i, 0)),   # logits tile
                pl.BlockSpec((tb, 1), lambda i: (i, 0)),   # targets tile
            ],
            out_specs=pl.BlockSpec((8, 128), lambda i: (0, i)),
        ),
        compiler_params=pltpu.CompilerParams(
            dimension_semantics=("parallel",),   # independent blocks -> 2 TCs on v7x
        ),
        cost_estimate=cost,
    )(inputs, targets2d)

    # One partial sum per grid block lives in [0, block*128]; finish the reduction
    # and the mean (exactly once) on the wrapper side.
    per_block = partials[0].reshape(num_blocks, 128)[:, 0]
    return jnp.sum(per_block) / jnp.float32(B)


def _reference_focal_loss(inputs, targets):
    # Pure-JAX reference (matches the PyTorch module's forward).
    log_probs = jax.nn.log_softmax(inputs.astype(jnp.float32), axis=-1)
    ce = -jnp.take_along_axis(log_probs, targets[:, None], axis=-1)[:, 0]
    pt = jnp.exp(-ce)
    return jnp.mean(ALPHA * (1.0 - pt) ** 2 * ce)


if __name__ == "__main__":
    key = jax.random.PRNGKey(0)
    k1, k2 = jax.random.split(key)

    B, C = 8, 128  # small [batch_size, num_classes] consistent with the module
    logits = jax.random.normal(k1, (B, C), dtype=jnp.float32)
    targets = jax.random.randint(k2, (B,), 0, C, dtype=jnp.int32)

    loss = focal_loss(logits, targets)
    jax.block_until_ready(loss)

    ref = _reference_focal_loss(logits, targets)
    assert jnp.allclose(loss, ref, rtol=1e-5, atol=1e-6), (loss, ref)

    print("KERNEL_OK")
</pallas_src>

<mosaic_0001>
module attributes {stable_mosaic.version = 11 : i64} {
  func.func @_focal_loss_kernel(%arg0: i32, %arg1: memref<8x128xf32, #tpu.memory_space<vmem>>, %arg2: memref<8x1xi32, #tpu.memory_space<vmem>>, %arg3: memref<8x128xf32, #tpu.memory_space<vmem>>) attributes {dimension_semantics = [#tpu.dimension_semantics<parallel>], iteration_bounds = array<i64: 1>, scalar_prefetch = 0 : i64, scratch_operands = 0 : i64, tpu.core_type = #tpu.core_type<tc>, window_params = [{transform_indices = @transform_0, window_bounds = array<i64: 8, 128>}, {transform_indices = @transform_1, window_bounds = array<i64: 8, 1>}, {transform_indices = @transform_2, window_bounds = array<i64: 8, 128>}]} {
    %c0 = arith.constant 0 : index
    %c0_0 = arith.constant 0 : index
    %0 = vector.load %arg1[%c0, %c0_0] : memref<8x128xf32, #tpu.memory_space<vmem>>, vector<8x128xf32>
    %c0_1 = arith.constant 0 : index
    %c0_2 = arith.constant 0 : index
    %1 = vector.load %arg2[%c0_1, %c0_2] : memref<8x1xi32, #tpu.memory_space<vmem>>, vector<8x1xi32>
    %cst = arith.constant dense<0xFF800000> : vector<8xf32>
    %2 = vector.multi_reduction <maximumf>, %0, %cst [1] : vector<8x128xf32> to vector<8xf32>
    %3 = vector.shape_cast %2 : vector<8xf32> to vector<8x1xf32>
    %4 = vector.broadcast %3 : vector<8x1xf32> to vector<8x128xf32>
    %5 = arith.subf %0, %4 : vector<8x128xf32>
    %6 = math.exp %5 : vector<8x128xf32>
    %cst_3 = arith.constant dense<0.000000e+00> : vector<8xf32>
    %7 = vector.multi_reduction <add>, %6, %cst_3 [1] : vector<8x128xf32> to vector<8xf32>
    %8 = vector.shape_cast %7 : vector<8xf32> to vector<8x1xf32>
    %9 = tpu.iota {dimensions = array<i32: 1>} : vector<8x128xi32>
    %10 = vector.broadcast %1 : vector<8x1xi32> to vector<8x128xi32>
    %11 = arith.cmpi eq, %9, %10 : vector<8x128xi32>
    %cst_4 = arith.constant 0.000000e+00 : f32
    %12 = vector.broadcast %cst_4 : f32 to vector<8x128xf32>
    %13 = arith.select %11, %5, %12 : vector<8x128xi1>, vector<8x128xf32>
    %cst_5 = arith.constant dense<0.000000e+00> : vector<8xf32>
    %14 = vector.multi_reduction <add>, %13, %cst_5 [1] : vector<8x128xf32> to vector<8xf32>
    %15 = vector.shape_cast %14 : vector<8xf32> to vector<8x1xf32>
    %16 = math.log %8 : vector<8x1xf32>
    %17 = arith.subf %16, %15 : vector<8x1xf32>
    %cst_6 = arith.constant 0.000000e+00 : f32
    %18 = vector.broadcast %cst_6 : f32 to vector<8x1xf32>
    %19 = arith.subf %18, %17 : vector<8x1xf32>
    %20 = math.exp %19 : vector<8x1xf32>
    %cst_7 = arith.constant 1.000000e+00 : f32
    %21 = vector.broadcast %cst_7 : f32 to vector<8x1xf32>
    %22 = arith.subf %21, %20 : vector<8x1xf32>
    %cst_8 = arith.constant 1.000000e+00 : f32
    %23 = vector.broadcast %cst_8 : f32 to vector<8x1xf32>
    %24 = arith.mulf %23, %22 : vector<8x1xf32>
    %25 = arith.mulf %24, %22 : vector<8x1xf32>
    %26 = arith.mulf %25, %17 : vector<8x1xf32>
    %c8_i32 = arith.constant 8 : i32
    %27 = arith.muli %arg0, %c8_i32 : i32
    %28 = tpu.iota {dimensions = array<i32: 0>} : vector<8x1xi32>
    %29 = vector.broadcast %27 : i32 to vector<8x1xi32>
    %30 = arith.addi %29, %28 : vector<8x1xi32>
    %c8_i32_9 = arith.constant 8 : i32
    %31 = vector.broadcast %c8_i32_9 : i32 to vector<8x1xi32>
    %32 = arith.cmpi slt, %30, %31 : vector<8x1xi32>
    %cst_10 = arith.constant 0.000000e+00 : f32
    %33 = vector.broadcast %cst_10 : f32 to vector<8x1xf32>
    %34 = arith.select %32, %26, %33 : vector<8x1xi1>, vector<8x1xf32>
    %35 = vector.shape_cast %34 : vector<8x1xf32> to vector<1x8x1xf32>
    %cst_11 = arith.constant dense<0.000000e+00> : vector<1xf32>
    %36 = vector.multi_reduction <add>, %35, %cst_11 [1, 2] : vector<1x8x1xf32> to vector<1xf32>
    %37 = vector.shape_cast %36 : vector<1xf32> to vector<1x1x1xf32>
    %38 = vector.extract %37[0, 0, 0] : f32 from vector<1x1x1xf32>
    %39 = vector.broadcast %38 : f32 to vector<8x128xf32>
    %c0_12 = arith.constant 0 : index
    %c0_13 = arith.constant 0 : index
    %40 = vector.load %arg3[%c0_12, %c0_13] : memref<8x128xf32, #tpu.memory_space<vmem>>, vector<8x128xf32>
    tpu.vector_store %arg3[%c0_12, %c0_13], %39 {strides = array<i32>} : memref<8x128xf32, #tpu.memory_space<vmem>>, vector<8x128xf32>,
    return
  }
  func.func @transform_0(%arg0: i32) -> (i32, i32) {
    %c0_i32 = arith.constant 0 : i32
    %c0_i32_0 = arith.constant 0 : i32
    return %arg0, %c0_i32 : i32, i32
  }
  func.func @transform_1(%arg0: i32) -> (i32, i32) {
    %c0_i32 = arith.constant 0 : i32
    %c0_i32_0 = arith.constant 0 : i32
    return %arg0, %c0_i32 : i32, i32
  }
  func.func @transform_2(%arg0: i32) -> (i32, i32) {
    %c0_i32 = arith.constant 0 : i32
    %c0_i32_0 = arith.constant 0 : i32
    return %c0_i32, %arg0 : i32, i32
  }
}

</mosaic_0001>

<bundles_post_ra>
// kernel: tpu_custom_call.1
= control target key start
LH: loop header
LB: loop body
LE: loop exit
PB: predicated region body
PF: predicated region fallthrough
CT: control target
= control target key end

     0   :  { %s132_s0 = inlined_call_operand.vmem [shape: f32[8,128], index: 0, kind: input, shape index: {}]   ;;  %s133_s1 = inlined_call_operand.vmem [shape: s32[8,1], index: 1, kind: input, shape index: {}]   ;;  %s134_s2 = inlined_call_operand.hbm [shape: f32[8,128], index: 2, kind: output, shape index: {}]  }
   0x1   :  { %v12_v0 = vld [vmem:[%s132_s0] sm:$0xff] }
   0x2   :  { %7 = vsyncpa [#allocation3], 0  ;;  %14 = vmax.xlane.f32.xlu0 %v12_v0  ;;  %v106_v1 = vmov 0   ;;  %v13_v2 = vld [vmem:[%s133_s1] sm:$0xff]  ;;  %v21_v6 = vlaneseq  ;;  %vm46_vm1 = vcmask 7168   ;;  %s107_s0 = smov [#allocation2]  }
   0x3   :  { %77 = vset.pattern.permute.xlu0 %v106_v1  ;;  %s65_s1 = sshll.u32 %s107_s0, 4  ;;  %s66_s1 = int_to_ptr.vmem [resolvable:$true] %s65_s1 }
   0x4   :  { %v22_v7 = vand.u32 127, %v21_v6  ;;  %s84_s14 = scalar_lea.vmem %s66_s1, 128  ;;  %p89_p1 = scmp.lt.s32.totalorder %s66_s1, %s66_s1 }
   0x5   :  { %p85_p0 = scmp.ne.s32.totalorder %s66_s1, %s84_s14  ;;  %p90_p2 = scmp.lt.s32.totalorder %s84_s14, %s84_s14 }
   0x7   :  { %p91_p3 = por %p90_p2, %p89_p1 }
   0x9   :  { %p92_p4 = pnand %p91_p3, %p85_p0 }
  0x18   :  { %24 = vperm.xlu0 %77, %v13_v2  }
  0x8b   :  { %v15_v3 = vpop.xlane.xlu0 %14 }
  0x8c   :  { %v16_v4 = vsub.f32 %v12_v0, %v15_v3 }
  0x8e   :  { %v17_v5 = vmul.f32 1.442695, %v16_v4 }
  0x90   :  { %78 = vpow2.f32 %v17_v5 }
  0x93   :  { %v25_v8 = vpop.permute.xlu0 %24 }
  0x94   :  { %vm26_vm0 = vcmp.eq.s32.totalorder %v22_v7, %v25_v8 }
  0x95   :  { %v27_v10 = vsel %vm26_vm0, %v16_v4, 0.0 }
  0x9d   :  { %v79_v9 = vpop.eup %78 }
  0x9e   :  { %19 = vadd.xlane.f32.xlu1 %v79_v9 }
  0xa2   :  { %28 = vadd.xlane.f32.xlu1 %v27_v10 }
 0x127   :  { %v20_v11 = vpop.xlane.xlu1 %19 }
 0x128   :  { %80 = vlog2.f32 %v20_v11 }
 0x12b   :  { %v29_v14 = vpop.xlane.xlu1 %28 }
 0x135   :  { %v81_v12 = vpop.eup %80 }
 0x136   :  { %v31_v13 = vmul.f32 0.6931472, %v81_v12 }
 0x138   :  { %v32_v15 = vsub.f32 %v31_v13, %v29_v14 }
 0x13a   :  { %v33_v16 = vsub.f32 0.0, %v32_v15 }
 0x13c   :  { %v34_v17 = vmul.f32 1.442695, %v33_v16 }
 0x13e   :  { %82 = vpow2.f32 %v34_v17 }
 0x14b   :  { %v83_v18 = vpop.eup %82 }
 0x14c   :  { %v36_v19 = vsub.f32 1.0, %v83_v18 }
 0x14e   :  { %v37_v20 = vmul.f32 %v36_v19, %v36_v19 }
 0x150   :  { %v38_v21 = vmul.f32 %v37_v20, %v32_v15 }
 0x152   :  { %v47_v22 = vsel %vm46_vm1, %v38_v21, 0.0 }
 0x153   :  { %48 = vadd.xlane.f32.xlu1 %v47_v22 }
 0x1dc   :  { %v49_v23 = vpop.xlane.xlu1 %48 }
 0x1dd   :  { %v50_v24 = vrot.slane %v49_v23, 4 }
 0x1df   :  { %v51_v25 = vadd.f32 %v50_v24, %v49_v23 }
 0x1e1   :  { %v52_v26 = vrot.slane %v51_v25, 2 }
 0x1e3   :  { %v53_v27 = vadd.f32 %v52_v26, %v51_v25 }
 0x1e5   :  { %v54_v28 = vrot.slane %v53_v27, 1 }
 0x1e7   :  { %v55_v29 = vadd.f32 %v54_v28, %v53_v27 }
 0x1e9   :  { %73 = vpush %v55_v29 }
 0x21a   :  { %s74_s13 = spop %73 }
 0x21b   :  { %v57_v30 = vstv %s74_s13 }
 0x21c   :  { %58 = vst [vmem:[#allocation2] sm:$0xff] %v57_v30 }
 0x21d   :  { %95 = shalt.err (!%p92_p4)
}
 0x21e   :  { %68 = dma.vmem_to_hbm [thread:$0]  %s66_s1, 128, %s134_s2, [#allocation3]  }
 0x21f   :  { %104 = dma.done.wait [#allocation3], 128  }
 0x220   :  { %105 = vsyncadd [#allocation3], 4294967168 }
 0x221   :  { %72 = vsyncpa [#allocation3], 1 }

</bundles_post_ra>
